<compile_context>
chip_gen: v6e
topology: v6e:2x2x1
jax: 0.10.0
libtpu: 0.0.40
codegen_flags: <defaults>
</compile_context>

<pallas_src>
import functools

import jax
import jax.numpy as jnp
from jax.experimental import pallas as pl
from jax.experimental.pallas import tpu as pltpu

LN_EPS = 1e-5  # nn.LayerNorm default


def _round_up(x, m):
    return ((x + m - 1) // m) * m


def _proj_kernel(x_ref, *refs, matmul_stats):
    # x_ref: (TMp, P*D_in)  P original rows packed per sublane row (lane-dense)
    # matmul_stats=True : refs = (a_in, a_out, w, b, o)
    #   a_in : (P*D_in, P*D_in)  block-diag averaging matrix (segmented mean)
    #   a_out: (P*D_in, P*D_out) block-diag averaging matrix at OUTPUT width
    # matmul_stats=False: refs = (w, b, o), stats via lane reductions (P == 1)
    #   w    : (P*D_in, P*D_out) block-diag (gamma-folded) Linear weight
    #   b    : (1, P*D_out)      (beta-folded) Linear bias, tiled P times
    #   o    : (TMp, P*D_out)    lane-dense output tile
    if matmul_stats:
        a_in_ref, a_out_ref, w_ref, b_ref, o_ref = refs
    else:
        w_ref, b_ref, o_ref = refs

    xf = x_ref[...].astype(jnp.float32)

    if matmul_stats:
        # Segmented per-original-row LayerNorm stats via block-diag MXU
        # matmuls -> no cross-lane reshapes; exact two-pass variance.
        mean = jnp.dot(xf, a_in_ref[...], preferred_element_type=jnp.float32)
        xc = xf - mean
        # Variance broadcast directly at output lane width: the per-row
        # 1/sqrt(var) scalar commutes with the block-diagonal Linear, so the
        # rsqrt + scale happen on the narrower (TMp, P*D_out) tile.
        var = jnp.dot(xc * xc, a_out_ref[...],
                      preferred_element_type=jnp.float32)
    else:
        mean = jnp.mean(xf, axis=-1, keepdims=True)
        xc = xf - mean
        var = jnp.mean(xc * xc, axis=-1, keepdims=True)

    inv_std = jax.lax.rsqrt(var + LN_EPS)

    # LN gamma is pre-folded into w_ref, beta into b_ref (see wrapper).
    y = jnp.dot(xc.astype(w_ref.dtype), w_ref[...],
                preferred_element_type=jnp.float32)
    y = y * inv_std + b_ref[...]
    o_ref[...] = jnp.tanh(y).astype(o_ref.dtype)


@functools.partial(jax.jit, static_argnames=("row_tile",))
def projection_network(x, ln_gamma, ln_beta, lin_w, lin_b, *, row_tile=None):
    """x: [B, S, D_in] -> [B, S, D_out].  lin_w is nn.Linear layout (D_out, D_in)."""
    B, S, D_in = x.shape
    D_out = lin_w.shape[0]
    rows = B * S
    dtype = x.dtype
    itemsize = jnp.dtype(dtype).itemsize
    sub = {4: 8, 2: 16, 1: 32}.get(itemsize, 8)   # sublane quantum

    # Lane-packing factor: pack P consecutive rows along lanes so the output
    # tile is ~128 lanes wide even for small D_out.  Cap the packed input
    # width so the block-diag stats matrices stay small in VMEM.
    P = max(1, 128 // D_out) if D_out < 128 else 1
    while P > 1 and P * D_in > 1024:
        P //= 2
    quantum = P * sub                             # row_tile granularity

    if row_tile is None:
        # Target ~2K rows/step, but split evenly so padding never exceeds one
        # quantum per tile (old scheme could pad up to a full 2K-row tile).
        target = 2048
        n_tiles = max(1, -(-rows // target))
        row_tile = _round_up(-(-rows // n_tiles), quantum)
    else:
        row_tile = _round_up(max(1, row_tile), quantum)

    rows_pad = _round_up(rows, row_tile)          # pad instead of asserting
    x2 = x.reshape(rows, D_in)
    if rows_pad != rows:
        x2 = jnp.pad(x2, ((0, rows_pad - rows), (0, 0)))

    tm_p = row_tile // P
    din_p = P * D_in
    dout_p = P * D_out

    # Contiguous (free) lane-packing reshape.
    xp = x2.reshape(rows_pad // P, din_p)

    f32 = jnp.float32
    # Fold the LN affine into the Linear (done once in the wrapper):
    #   y = ((x - mu) * rstd * gamma) @ W^T + beta @ W^T + b
    #     = ((x - mu) @ (gamma * W)^T) * rstd + (W @ beta + b)
    w_eff_t = (lin_w.astype(f32) * ln_gamma.astype(f32)[None, :]).T  # (D_in, D_out)
    b_eff = lin_b.astype(f32) + lin_w.astype(f32) @ ln_beta.astype(f32)

    w_blk = jnp.kron(jnp.eye(P, dtype=lin_w.dtype),
                     w_eff_t.astype(lin_w.dtype))        # (P*D_in, P*D_out)
    b_p = jnp.tile(b_eff, P).reshape(1, dout_p)

    matmul_stats = P > 1
    operands = [xp]
    in_specs = [pl.BlockSpec((tm_p, din_p), lambda i: (i, 0))]
    if matmul_stats:
        eye_p = jnp.eye(P, dtype=f32)
        a_in = jnp.kron(eye_p, jnp.full((D_in, D_in), 1.0 / D_in, dtype=f32))
        a_out = jnp.kron(eye_p, jnp.full((D_in, D_out), 1.0 / D_in, dtype=f32))
        operands += [a_in, a_out]
        in_specs += [pl.BlockSpec((din_p, din_p), lambda i: (0, 0)),
                     pl.BlockSpec((din_p, dout_p), lambda i: (0, 0))]
    operands += [w_blk, b_p]
    in_specs += [pl.BlockSpec((din_p, dout_p), lambda i: (0, 0)),
                 pl.BlockSpec((1, dout_p), lambda i: (0, 0))]

    # Memory-bound op: tell XLA the true byte traffic.
    w_itemsize = jnp.dtype(lin_w.dtype).itemsize
    const_bytes = w_blk.size * w_itemsize + dout_p * 4
    stat_flops = 0
    if matmul_stats:
        const_bytes += (din_p * din_p + din_p * dout_p) * 4
        stat_flops = 2 * (rows_pad // P) * din_p * (din_p + dout_p)
    cost = pl.CostEstimate(
        flops=int(2 * rows_pad * D_in * D_out + stat_flops + 8 * rows_pad * D_in),
        transcendentals=int(2 * rows_pad * D_out),
        bytes_accessed=int(rows_pad * (D_in + D_out) * itemsize + const_bytes),
    )

    out_p = pl.pallas_call(
        functools.partial(_proj_kernel, matmul_stats=matmul_stats),
        out_shape=jax.ShapeDtypeStruct((rows_pad // P, dout_p), dtype),
        grid_spec=pltpu.PrefetchScalarGridSpec(
            num_scalar_prefetch=0,
            grid=(rows_pad // row_tile,),
            in_specs=in_specs,
            out_specs=pl.BlockSpec((tm_p, dout_p), lambda i: (i, 0)),
        ),
        compiler_params=pltpu.CompilerParams(
            dimension_semantics=("parallel",)),
        cost_estimate=cost,
    )(*operands)

    # Contiguous (free) un-pack + drop padding rows.
    out2 = out_p.reshape(rows_pad, D_out)[:rows]
    return out2.reshape(B, S, D_out)


def _reference(x, ln_gamma, ln_beta, lin_w, lin_b):
    xf = x.astype(jnp.float32)
    mean = jnp.mean(xf, axis=-1, keepdims=True)
    var = jnp.mean((xf - mean) ** 2, axis=-1, keepdims=True)
    xn = (xf - mean) / jnp.sqrt(var + LN_EPS)
    xn = xn * ln_gamma + ln_beta
    y = xn @ lin_w.T.astype(jnp.float32) + lin_b
    return jnp.tanh(y).astype(x.dtype)


if __name__ == "__main__":
    # ProjectionNetwork(input_dim=64, output_dim=32, inp_merge='mlp',
    #                   layer_norm_all_features=True, input_dropout=0.0,
    #                   tf_out_act=torch.tanh)
    B, S = 3, 20            # rows = 60: exercises padding + multi-step grid
    D_IN, D_OUT = 64, 32

    key = jax.random.PRNGKey(0)
    kx, kw, kb, kg, kbe = jax.random.split(key, 5)

    x = jax.random.normal(kx, (B, S, D_IN), dtype=jnp.float32)

    # Non-trivial LN affine to exercise the gamma/beta folding.
    ln_gamma = 1.0 + 0.1 * jax.random.normal(kg, (D_IN,), dtype=jnp.float32)
    ln_beta = 0.1 * jax.random.normal(kbe, (D_IN,), dtype=jnp.float32)
    bound = 1.0 / (D_IN ** 0.5)
    lin_w = jax.random.uniform(kw, (D_OUT, D_IN), jnp.float32, -bound, bound)
    lin_b = jax.random.uniform(kb, (D_OUT,), jnp.float32, -bound, bound)

    ref = _reference(x, ln_gamma, ln_beta, lin_w, lin_b)

    # Explicit small tile -> multi-step grid (pipelined, row-padded).
    out_tiled = projection_network(x, ln_gamma, ln_beta, lin_w, lin_b,
                                   row_tile=32)
    out_tiled = jax.block_until_ready(out_tiled)
    assert out_tiled.shape == (B, S, D_OUT)
    assert jnp.allclose(out_tiled, ref, atol=3e-5, rtol=3e-5), \
        "mismatch vs reference (tiled)"

    # Default (auto) tiling path.
    out_auto = projection_network(x, ln_gamma, ln_beta, lin_w, lin_b)
    out_auto = jax.block_until_ready(out_auto)
    assert jnp.allclose(out_auto, ref, atol=3e-5, rtol=3e-5), \
        "mismatch vs reference (auto tile)"

    print("KERNEL_OK")
</pallas_src>

<mosaic_0001>
module attributes {stable_mosaic.version = 11 : i64} {
  func.func @_proj_kernel(%arg0: i32, %arg1: memref<8x256xf32, #tpu.memory_space<vmem>>, %arg2: memref<256x256xf32, #tpu.memory_space<vmem>>, %arg3: memref<256x128xf32, #tpu.memory_space<vmem>>, %arg4: memref<256x128xf32, #tpu.memory_space<vmem>>, %arg5: memref<1x128xf32, #tpu.memory_space<vmem>>, %arg6: memref<8x128xf32, #tpu.memory_space<vmem>>) attributes {dimension_semantics = [#tpu.dimension_semantics<parallel>], iteration_bounds = array<i64: 2>, scalar_prefetch = 0 : i64, scratch_operands = 0 : i64, tpu.core_type = #tpu.core_type<tc>, window_params = [{transform_indices = @transform_0, window_bounds = array<i64: 8, 256>}, {pipeline_mode = #tpu.pipeline_mode<synchronous>, transform_indices = @transform_1, window_bounds = array<i64: 256, 256>}, {pipeline_mode = #tpu.pipeline_mode<synchronous>, transform_indices = @transform_2, window_bounds = array<i64: 256, 128>}, {pipeline_mode = #tpu.pipeline_mode<synchronous>, transform_indices = @transform_3, window_bounds = array<i64: 256, 128>}, {pipeline_mode = #tpu.pipeline_mode<synchronous>, transform_indices = @transform_4, window_bounds = array<i64: 1, 128>}, {transform_indices = @transform_5, window_bounds = array<i64: 8, 128>}]} {
    %c0 = arith.constant 0 : index
    %c0_0 = arith.constant 0 : index
    %0 = vector.load %arg1[%c0, %c0_0] : memref<8x256xf32, #tpu.memory_space<vmem>>, vector<8x256xf32>
    %c0_1 = arith.constant 0 : index
    %c0_2 = arith.constant 0 : index
    %1 = vector.load %arg2[%c0_1, %c0_2] : memref<256x256xf32, #tpu.memory_space<vmem>>, vector<256x256xf32>
    %cst = arith.constant dense<0.000000e+00> : vector<8x256xf32>
    %2 = tpu.matmul %0, %1, %cst {dimension_numbers = #tpu.dot_dimension_numbers<[1], [0], [0], [1], [0, 0, 1, 1], [], []>} : vector<8x256xf32>, vector<256x256xf32>, vector<8x256xf32> -> vector<8x256xf32>
    %3 = arith.subf %0, %2 : vector<8x256xf32>
    %4 = arith.mulf %3, %3 : vector<8x256xf32>
    %c0_3 = arith.constant 0 : index
    %c0_4 = arith.constant 0 : index
    %5 = vector.load %arg3[%c0_3, %c0_4] : memref<256x128xf32, #tpu.memory_space<vmem>>, vector<256x128xf32>
    %cst_5 = arith.constant dense<0.000000e+00> : vector<8x128xf32>
    %6 = tpu.matmul %4, %5, %cst_5 {dimension_numbers = #tpu.dot_dimension_numbers<[1], [0], [0], [1], [0, 0, 1, 1], [], []>} : vector<8x256xf32>, vector<256x128xf32>, vector<8x128xf32> -> vector<8x128xf32>
    %cst_6 = arith.constant 9.99999974E-6 : f32
    %7 = vector.broadcast %cst_6 : f32 to vector<8x128xf32>
    %8 = arith.addf %6, %7 : vector<8x128xf32>
    %9 = math.rsqrt %8 : vector<8x128xf32>
    %c0_7 = arith.constant 0 : index
    %c0_8 = arith.constant 0 : index
    %10 = vector.load %arg4[%c0_7, %c0_8] : memref<256x128xf32, #tpu.memory_space<vmem>>, vector<256x128xf32>
    %cst_9 = arith.constant dense<0.000000e+00> : vector<8x128xf32>
    %11 = tpu.matmul %3, %10, %cst_9 {dimension_numbers = #tpu.dot_dimension_numbers<[1], [0], [0], [1], [0, 0, 1, 1], [], []>} : vector<8x256xf32>, vector<256x128xf32>, vector<8x128xf32> -> vector<8x128xf32>
    %12 = arith.mulf %11, %9 : vector<8x128xf32>
    %c0_10 = arith.constant 0 : index
    %c0_11 = arith.constant 0 : index
    %13 = vector.load %arg5[%c0_10, %c0_11] : memref<1x128xf32, #tpu.memory_space<vmem>>, vector<1x128xf32>
    %14 = vector.broadcast %13 : vector<1x128xf32> to vector<8x128xf32>
    %15 = arith.addf %12, %14 : vector<8x128xf32>
    %16 = math.tanh %15 : vector<8x128xf32>
    %c0_12 = arith.constant 0 : index
    %c0_13 = arith.constant 0 : index
    %17 = vector.load %arg6[%c0_12, %c0_13] : memref<8x128xf32, #tpu.memory_space<vmem>>, vector<8x128xf32>
    tpu.vector_store %arg6[%c0_12, %c0_13], %16 {strides = array<i32>} : memref<8x128xf32, #tpu.memory_space<vmem>>, vector<8x128xf32>,
    return
  }
  func.func @transform_0(%arg0: i32) -> (i32, i32) {
    %c0_i32 = arith.constant 0 : i32
    %c0_i32_0 = arith.constant 0 : i32
    return %arg0, %c0_i32 : i32, i32
  }
  func.func @transform_1(%arg0: i32) -> (i32, i32) {
    %c0_i32 = arith.constant 0 : i32
    %c0_i32_0 = arith.constant 0 : i32
    %c0_i32_1 = arith.constant 0 : i32
    return %c0_i32, %c0_i32_0 : i32, i32
  }
  func.func @transform_2(%arg0: i32) -> (i32, i32) {
    %c0_i32 = arith.constant 0 : i32
    %c0_i32_0 = arith.constant 0 : i32
    %c0_i32_1 = arith.constant 0 : i32
    return %c0_i32, %c0_i32_0 : i32, i32
  }
  func.func @transform_3(%arg0: i32) -> (i32, i32) {
    %c0_i32 = arith.constant 0 : i32
    %c0_i32_0 = arith.constant 0 : i32
    %c0_i32_1 = arith.constant 0 : i32
    return %c0_i32, %c0_i32_0 : i32, i32
  }
  func.func @transform_4(%arg0: i32) -> (i32, i32) {
    %c0_i32 = arith.constant 0 : i32
    %c0_i32_0 = arith.constant 0 : i32
    %c0_i32_1 = arith.constant 0 : i32
    return %c0_i32, %c0_i32_0 : i32, i32
  }
  func.func @transform_5(%arg0: i32) -> (i32, i32) {
    %c0_i32 = arith.constant 0 : i32
    %c0_i32_0 = arith.constant 0 : i32
    return %arg0, %c0_i32 : i32, i32
  }
}

</mosaic_0001>

<bundles_post_ra>
// kernel: tile.8
= control target key start
LH: loop header
LB: loop body
LE: loop exit
PB: predicated region body
PF: predicated region fallthrough
CT: control target
= control target key end

     0   :  { %s22_s0 = inlined_call_operand.vmem [shape: f32[32], index: 0, kind: input, shape index: {}]   ;;  %s23_s1 = inlined_call_operand.vmem [shape: f32[4,32], index: 1, kind: output, shape index: {}]  }
   0x1   :  { %v4_v0 = vld [vmem:[%s22_s0] ss:$0 sm:$0xff] }
   0x2   :  { %5 = vst [vmem:[%s23_s1] sm:$0xf] %v4_v0 }

// kernel: tile.9
= control target key start
LH: loop header
LB: loop body
LE: loop exit
PB: predicated region body
PF: predicated region fallthrough
CT: control target
= control target key end

     0   :  { %vm8_vm0 = vcmask 261120   ;;  %s40_s8 = smov 32   ;;  %s41_s9 = smov 64   ;;  %vm14_vm1 = vcmask 1048320   ;;  %vm20_vm2 = vcmask 785920   ;;  %vm26_vm3 = vcmask 523520   ;;  %s58_s0 = inlined_call_operand.vmem [shape: f32[4,32], index: 0, kind: input, shape index: {}]   ;;  %s59_s1 = inlined_call_operand.vmem [shape: f32[1,128], index: 1, kind: output, shape index: {}]  }
   0x1   :  { %v5_v0 = vld [vmem:[%s58_s0] sm:$0xf]  ;;  %s39_s0 = smov 96  }
   0x2   :  { %6 = vst [vmem:[#allocation1] sm:$0xf] %v5_v0 }
   0x9   :  { %v11_v1 = vld [vmem:[#allocation1 + $0x3] sm:$0x1]   ;;  %v23_v2 = vld [vmem:[#allocation1 + $0x1] sm:$0x1]   ;;  %v7_v3 = vld [vmem:[#allocation1] sm:$0x1]  }
   0xa   :  { %12 = vrot.lane.b32.xlu0 %v11_v1, %s39_s0  ;;  %24 = vrot.lane.b32.xlu1 %v23_v2, %s40_s8  ;;  %v17_v4 = vld [vmem:[#allocation1 + $0x2] sm:$0x1]   ;;  %9 = vst.msk [vmem:[#allocation0] sm:$0x1] %vm8_vm0, %v7_v3  }
   0xe   :  { %18 = vrot.lane.b32.xlu0 %v17_v4, %s41_s9 }
  0x7c   :  { %v13_v5 = vpop.permute.xlu0 %12   ;;  %v25_v6 = vpop.permute.xlu1 %24  }
  0x7d   :  { %15 = vst.msk [vmem:[#allocation0] sm:$0x1] %vm14_vm1, %v13_v5  }
  0x80   :  { %v19_v7 = vpop.permute.xlu0 %18  }
  0x81   :  { %21 = vst.msk [vmem:[#allocation0] sm:$0x1] %vm20_vm2, %v19_v7  }
  0x82   :  { %27 = vst.msk [vmem:[#allocation0] sm:$0x1] %vm26_vm3, %v25_v6  }
  0x89   :  { %v32_v8 = vld [vmem:[#allocation0] sm:$0x1] }
  0x8a   :  { %35 = vst [vmem:[%s59_s1] sm:$0x1] %v32_v8 }

// kernel: projection_network.1
= control target key start
LH: loop header
LB: loop body
LE: loop exit
PB: predicated region body
PF: predicated region fallthrough
CT: control target
= control target key end

     0   :  { %s765_s18 = smov 0   ;;  %s1190_s0 = inlined_call_operand.vmem [shape: f32[16,256], index: 0, kind: input, shape index: {}]   ;;  %s1191_s1 = inlined_call_operand.vmem [shape: f32[256,256], index: 1, kind: input, shape index: {}]   ;;  %s1192_s2 = inlined_call_operand.vmem [shape: f32[256,128], index: 2, kind: input, shape index: {}]   ;;  %s1193_s3 = inlined_call_operand.vmem [shape: f32[256,128], index: 3, kind: input, shape index: {}]   ;;  %s1194_s4 = inlined_call_operand.vmem [shape: f32[1,128], index: 4, kind: input, shape index: {}]   ;;  %s1195_s5 = inlined_call_operand.vmem [shape: f32[16,128], index: 5, kind: output, shape index: {}]  }
   0x1 LB: > { %s633_s19 = sadd.s32 4294967295, %s733_s18   ;;  %p637_p0 = scmp.ge.s32.totalorder %s733_s18, 1  ;;  %s733_s18 = sphi %s765_s18, %s15_s18  }
   0x2   : > { %p187_p1 = scmp.lt.s32.totalorder %s733_s18, 3 }
   0x4   : > { %p188_p2 = pnand %p637_p0, %p187_p1 }
   0x5   : > { %p214_p3 = scmp.lt.s32.totalorder (!%p188_p2), %s633_s19, 1 }
   0x6   : > { %191 = sbr.rel (%p188_p2) target bundleno = 524 (0x20c), region = 40 }
   0xb   : > { %v256_v0 = vld [vmem:[%s1191_s1 + $0xf8] sm:$0xff]  ;;  %v255_v1 = vld [vmem:[%s1191_s1 + $0xf0] sm:$0xff]  ;;  %v254_v2 = vld [vmem:[%s1191_s1 + $0xe8] sm:$0xff]  ;;  %s1197_s19 = smov (!%p214_p3, %s633_s19), 1 }
   0xc   : > { %289 = vmatprep.subr.mxu0 %v256_v0  ;;  %v253_v3 = vld [vmem:[%s1191_s1 + $0xe0] sm:$0xff]  ;;  %v252_v4 = vld [vmem:[%s1191_s1 + $0xd8] sm:$0xff]  ;;  %v251_v5 = vld [vmem:[%s1191_s1 + $0xd0] sm:$0xff]  ;;  %s644_s8 = sshll.u32 %s1197_s19, 4  ;;  %s640_s9 = sshll.u32 %s1197_s19, 3 }
   0xd   : > { %290 = vmatpush1.msra.mxu0 %v255_v1  ;;  %v250_v6 = vld [vmem:[%s1191_s1 + $0xc8] sm:$0xff]  ;;  %v249_v7 = vld [vmem:[%s1191_s1 + $0xc0] sm:$0xff]  ;;  %v248_v8 = vld [vmem:[%s1191_s1 + $0xb8] sm:$0xff]  ;;  %s846_s17 = scalar_lea.vmem %s1190_s0, %s644_s8  ;;  %s222_s12 = scalar_lea.vmem %s1195_s5, %s640_s9 }
   0xe   : > { %291 = vmatprep.subr.mxu0 %v254_v2  ;;  %v247_v9 = vld [vmem:[%s1191_s1 + $0xb0] sm:$0xff]  ;;  %v246_v10 = vld [vmem:[%s1191_s1 + $0xa8] sm:$0xff]  ;;  %v245_v11 = vld [vmem:[%s1191_s1 + $0xa0] sm:$0xff] }
   0xf   : > { %292 = vmatpush1.msra.mxu0 %v253_v3  ;;  %v244_v12 = vld [vmem:[%s1191_s1 + $0x98] sm:$0xff]  ;;  %v243_v13 = vld [vmem:[%s1191_s1 + $0x90] sm:$0xff]  ;;  %v242_v14 = vld [vmem:[%s1191_s1 + $0x88] sm:$0xff] }
  0x10   : > { %293 = vmatprep.subr.mxu0 %v252_v4  ;;  %v241_v15 = vld [vmem:[%s1191_s1 + $0x80] sm:$0xff]  ;;  %v240_v16 = vld [vmem:[%s1191_s1 + $0x78] sm:$0xff]  ;;  %v239_v17 = vld [vmem:[%s1191_s1 + $0x70] sm:$0xff] }
  0x11   : > { %294 = vmatpush1.msra.mxu0 %v251_v5  ;;  %v238_v18 = vld [vmem:[%s1191_s1 + $0x68] sm:$0xff]  ;;  %v237_v19 = vld [vmem:[%s1191_s1 + $0x60] sm:$0xff]  ;;  %v236_v20 = vld [vmem:[%s1191_s1 + $0x58] sm:$0xff] }
  0x12   : > { %295 = vmatprep.subr.mxu0 %v250_v6  ;;  %v235_v21 = vld [vmem:[%s1191_s1 + $0x50] sm:$0xff]  ;;  %v234_v22 = vld [vmem:[%s1191_s1 + $0x48] sm:$0xff]  ;;  %v233_v23 = vld [vmem:[%s1191_s1 + $0x40] sm:$0xff] }
  0x13   : > { %296 = vmatpush1.msra.mxu0 %v249_v7  ;;  %v232_v24 = vld [vmem:[%s1191_s1 + $0x38] sm:$0xff]  ;;  %v861_v25 = vld [vmem:[%s846_s17 + $0x8] sm:$0xff]  ;;  %v394_v28 = vld [vmem:[%s1192_s2 + $0xf0] sm:$0xff] }
  0x14   : > { %297 = vmatprep.subr.mxu0 %v248_v8  ;;  %353 = vmatprep.mubr.f32.mxu0 %v861_v25  ;;  %v395_v26 = vld [vmem:[%s1192_s2 + $0xf8] sm:$0xff]  ;;  %v231_v29 = vld [vmem:[%s1191_s1 + $0x30] sm:$0xff]  ;;  %v230_v31 = vld [vmem:[%s1191_s1 + $0x28] sm:$0xff] }
  0x15   : > { %298 = vmatpush1.msra.mxu0 %v247_v9  ;;  %v379_v27 = vld [vmem:[%s1192_s2 + $0x78] sm:$0xff]  ;;  %645 = vmatprep.subr.mxu1 %v395_v26  ;;  %v378_v30 = vld [vmem:[%s1192_s2 + $0x70] sm:$0xff]  ;;  %v393_v32 = vld [vmem:[%s1192_s2 + $0xe8] sm:$0xff] }
  0x16   : > { %299 = vmatprep.subr.mxu0 %v246_v10  ;;  %646 = vmatpush3.msra.mxu1 %v379_v27  ;;  %v229_v33 = vld [vmem:[%s1191_s1 + $0x20] sm:$0xff]  ;;  %v377_v34 = vld [vmem:[%s1192_s2 + $0x68] sm:$0xff]  ;;  %v228_v35 = vld [vmem:[%s1191_s1 + $0x18] sm:$0xff] }
  0x17   : > { %300 = vmatpush1.msra.mxu0 %v245_v11  ;;  %647 = vmatprep.subr.mxu1 %v394_v28  ;;  %v392_v36 = vld [vmem:[%s1192_s2 + $0xe0] sm:$0xff]  ;;  %v227_v37 = vld [vmem:[%s1191_s1 + $0x10] sm:$0xff]  ;;  %v226_v39 = vld [vmem:[%s1191_s1 + $0x8] sm:$0xff] }
  0x18   : > { %301 = vmatprep.subr.mxu0 %v244_v12  ;;  %648 = vmatpush3.msra.mxu1 %v378_v30  ;;  %v376_v38 = vld [vmem:[%s1192_s2 + $0x60] sm:$0xff]  ;;  %v391_v40 = vld [vmem:[%s1192_s2 + $0xd8] sm:$0xff]  ;;  %v390_v44 = vld [vmem:[%s1192_s2 + $0xd0] sm:$0xff] }
  0x19   : > { %302 = vmatpush1.msra.mxu0 %v243_v13  ;;  %649 = vmatprep.subr.mxu1 %v393_v32  ;;  %v225_v41 = vld [vmem:[%s1191_s1] sm:$0xff]  ;;  %v375_v42 = vld [vmem:[%s1192_s2 + $0x58] sm:$0xff]  ;;  %v287_v45 = vld [vmem:[%s1191_s1 + $0x1f0] sm:$0xff] }
  0x1a   : > { %303 = vmatprep.subr.mxu0 %v242_v14  ;;  %650 = vmatpush3.msra.mxu1 %v377_v34  ;;  %v288_v43 = vld [vmem:[%s1191_s1 + $0x1f8] sm:$0xff]  ;;  %v374_v46 = vld [vmem:[%s1192_s2 + $0x50] sm:$0xff]  ;;  %v286_v47 = vld [vmem:[%s1191_s1 + $0x1e8] sm:$0xff] }
  0x1b   : > { %304 = vmatpush1.msra.mxu0 %v241_v15  ;;  %651 = vmatprep.subr.mxu1 %v392_v36  ;;  %v389_v48 = vld [vmem:[%s1192_s2 + $0xc8] sm:$0xff]  ;;  %v285_v49 = vld [vmem:[%s1191_s1 + $0x1e0] sm:$0xff]  ;;  %v284_v51 = vld [vmem:[%s1191_s1 + $0x1d8] sm:$0xff] }
  0x1c   : > { %305 = vmatprep.subr.mxu0 %v240_v16  ;;  %652 = vmatpush3.msra.mxu1 %v376_v38  ;;  %v373_v50 = vld [vmem:[%s1192_s2 + $0x48] sm:$0xff]  ;;  %v388_v52 = vld [vmem:[%s1192_s2 + $0xc0] sm:$0xff]  ;;  %v283_v53 = vld [vmem:[%s1191_s1 + $0x1d0] sm:$0xff] }
  0x1d   : > { %306 = vmatpush1.msra.mxu0 %v239_v17  ;;  %653 = vmatprep.subr.mxu1 %v391_v40  ;;  %v372_v54 = vld [vmem:[%s1192_s2 + $0x40] sm:$0xff]  ;;  %v282_v55 = vld [vmem:[%s1191_s1 + $0x1c8] sm:$0xff]  ;;  %v387_v56 = vld [vmem:[%s1192_s2 + $0xb8] sm:$0xff] }
  0x1e   : > { %307 = vmatprep.subr.mxu0 %v238_v18  ;;  %654 = vmatpush3.msra.mxu1 %v375_v42  ;;  %v281_v57 = vld [vmem:[%s1191_s1 + $0x1c0] sm:$0xff]  ;;  %v371_v58 = vld [vmem:[%s1192_s2 + $0x38] sm:$0xff]  ;;  %v386_v60 = vld [vmem:[%s1192_s2 + $0xb0] sm:$0xff] }
  0x1f   : > { %308 = vmatpush1.msra.mxu0 %v237_v19  ;;  %655 = vmatprep.subr.mxu1 %v390_v44  ;;  %v280_v59 = vld [vmem:[%s1191_s1 + $0x1b8] sm:$0xff]  ;;  %v279_v61 = vld [vmem:[%s1191_s1 + $0x1b0] sm:$0xff]  ;;  %v278_v63 = vld [vmem:[%s1191_s1 + $0x1a8] sm:$0xff] }
  0x20   : > { %309 = vmatprep.subr.mxu0 %v236_v20  ;;  %656 = vmatpush3.msra.mxu1 %v374_v46  ;;  %v370_v62 = vld [vmem:[%s1192_s2 + $0x30] sm:$0xff]  ;;  %v385_v0 = vld [vmem:[%s1192_s2 + $0xa8] sm:$0xff]  ;;  %v277_v1 = vld [vmem:[%s1191_s1 + $0x1a0] sm:$0xff] }
  0x21   : > { %310 = vmatpush1.msra.mxu0 %v235_v21  ;;  %657 = vmatprep.subr.mxu1 %v389_v48  ;;  %v369_v2 = vld [vmem:[%s1192_s2 + $0x28] sm:$0xff]  ;;  %v276_v3 = vld [vmem:[%s1191_s1 + $0x198] sm:$0xff]  ;;  %v384_v4 = vld [vmem:[%s1192_s2 + $0xa0] sm:$0xff] }
  0x22   : > { %311 = vmatprep.subr.mxu0 %v234_v22  ;;  %658 = vmatpush3.msra.mxu1 %v373_v50  ;;  %v275_v5 = vld [vmem:[%s1191_s1 + $0x190] sm:$0xff]  ;;  %v368_v6 = vld [vmem:[%s1192_s2 + $0x20] sm:$0xff]  ;;  %v274_v7 = vld [vmem:[%s1191_s1 + $0x188] sm:$0xff] }
  0x23   : > { %312 = vmatpush1.msra.mxu0 %v233_v23  ;;  %659 = vmatprep.subr.mxu1 %v388_v52  ;;  %v383_v8 = vld [vmem:[%s1192_s2 + $0x98] sm:$0xff]  ;;  %v273_v9 = vld [vmem:[%s1191_s1 + $0x180] sm:$0xff]  ;;  %v271_v11 = vld [vmem:[%s1191_s1 + $0x170] sm:$0xff] }
  0x24   : > { %313 = vmatprep.subr.mxu0 %v232_v24  ;;  %660 = vmatpush3.msra.mxu1 %v372_v54  ;;  %v272_v10 = vld [vmem:[%s1191_s1 + $0x178] sm:$0xff]  ;;  %v270_v12 = vld [vmem:[%s1191_s1 + $0x168] sm:$0xff]  ;;  %v269_v13 = vld [vmem:[%s1191_s1 + $0x160] sm:$0xff] }
  0x25   : > { %314 = vmatpush1.msra.mxu0 %v231_v29  ;;  %661 = vmatprep.subr.mxu1 %v387_v56  ;;  %v268_v14 = vld [vmem:[%s1191_s1 + $0x158] sm:$0xff]  ;;  %v267_v15 = vld [vmem:[%s1191_s1 + $0x150] sm:$0xff]  ;;  %v266_v16 = vld [vmem:[%s1191_s1 + $0x148] sm:$0xff] }
  0x26   : > { %315 = vmatprep.subr.mxu0 %v230_v31  ;;  %662 = vmatpush3.msra.mxu1 %v371_v58  ;;  %v265_v17 = vld [vmem:[%s1191_s1 + $0x140] sm:$0xff]  ;;  %v264_v18 = vld [vmem:[%s1191_s1 + $0x138] sm:$0xff]  ;;  %v263_v19 = vld [vmem:[%s1191_s1 + $0x130] sm:$0xff] }
  0x27   : > { %316 = vmatpush1.msra.mxu0 %v229_v33  ;;  %663 = vmatprep.subr.mxu1 %v386_v60  ;;  %v262_v20 = vld [vmem:[%s1191_s1 + $0x128] sm:$0xff]  ;;  %v261_v21 = vld [vmem:[%s1191_s1 + $0x120] sm:$0xff]  ;;  %v260_v22 = vld [vmem:[%s1191_s1 + $0x118] sm:$0xff] }
  0x28   : > { %317 = vmatprep.subr.mxu0 %v228_v35  ;;  %664 = vmatpush3.msra.mxu1 %v370_v62  ;;  %v259_v23 = vld [vmem:[%s1191_s1 + $0x110] sm:$0xff]  ;;  %v258_v24 = vld [vmem:[%s1191_s1 + $0x108] sm:$0xff]  ;;  %v257_v26 = vld [vmem:[%s1191_s1 + $0x100] sm:$0xff] }
  0x29   : > { %318 = vmatpush1.msra.mxu0 %v227_v37  ;;  %665 = vmatprep.subr.mxu1 %v385_v0  ;;  %v223_v27 = vld [vmem:[%s846_s17] sm:$0xff]  ;;  %v367_v28 = vld [vmem:[%s1192_s2 + $0x18] sm:$0xff]  ;;  %v382_v29 = vld [vmem:[%s1192_s2 + $0x90] sm:$0xff] }
  0x2a   : > { %319 = vmatprep.subr.mxu0 %v226_v39  ;;  %666 = vmatpush3.msra.mxu1 %v369_v2  ;;  %v366_v30 = vld [vmem:[%s1192_s2 + $0x10] sm:$0xff]  ;;  %v381_v31 = vld [vmem:[%s1192_s2 + $0x88] sm:$0xff]  ;;  %v380_v33 = vld [vmem:[%s1192_s2 + $0x80] sm:$0xff] }
  0x2b   : > { %320 = vmatpush1.msra.mxu0 %v225_v41  ;;  %667 = vmatprep.subr.mxu1 %v384_v4  ;;  %v365_v32 = vld [vmem:[%s1192_s2 + $0x8] sm:$0xff]  ;;  %v364_v34 = vld [vmem:[%s1192_s2] sm:$0xff]  ;;  %v498_v35 = vld [vmem:[%s1193_s3 + $0xf8] sm:$0xff] }
  0x2c   : > { %321 = vmatprep.subr.mxu0 %v288_v43  ;;  %668 = vmatpush3.msra.mxu1 %v368_v6  ;;  %v482_v42 = vld [vmem:[%s1193_s3 + $0x78] sm:$0xff]  ;;  %v497_v43 = vld [vmem:[%s1193_s3 + $0xf0] sm:$0xff]  ;;  %v495_v46 = vld [vmem:[%s1193_s3 + $0xe0] sm:$0xff] }
  0x2d   : > { %322 = vmatpush2.msra.mxu0 %v287_v45  ;;  %669 = vmatprep.subr.mxu1 %v383_v8  ;;  %v481_v44 = vld [vmem:[%s1193_s3 + $0x70] sm:$0xff]  ;;  %v480_v45 = vld [vmem:[%s1193_s3 + $0x68] sm:$0xff]  ;;  %v494_v48 = vld [vmem:[%s1193_s3 + $0xd8] sm:$0xff] }
  0x2e   : > { %323 = vmatprep.subr.mxu0 %v286_v47  ;;  %670 = vmatpush3.msra.mxu1 %v367_v28  ;;  %v479_v47 = vld [vmem:[%s1193_s3 + $0x60] sm:$0xff]  ;;  %v493_v50 = vld [vmem:[%s1193_s3 + $0xd0] sm:$0xff]  ;;  %v492_v52 = vld [vmem:[%s1193_s3 + $0xc8] sm:$0xff] }
  0x2f   : > { %324 = vmatpush2.msra.mxu0 %v285_v49  ;;  %671 = vmatprep.subr.mxu1 %v382_v29  ;;  %v478_v49 = vld [vmem:[%s1193_s3 + $0x58] sm:$0xff]  ;;  %v491_v54 = vld [vmem:[%s1193_s3 + $0xc0] sm:$0xff]  ;;  %v489_v58 = vld [vmem:[%s1193_s3 + $0xb0] sm:$0xff] }
  0x30   : > { %325 = vmatprep.subr.mxu0 %v284_v51  ;;  %672 = vmatpush3.msra.mxu1 %v366_v30  ;;  %v477_v51 = vld [vmem:[%s1193_s3 + $0x50] sm:$0xff]  ;;  %v490_v56 = vld [vmem:[%s1193_s3 + $0xb8] sm:$0xff]  ;;  %v488_v60 = vld [vmem:[%s1193_s3 + $0xa8] sm:$0xff] }
  0x31   : > { %326 = vmatpush2.msra.mxu0 %v283_v53  ;;  %673 = vmatprep.subr.mxu1 %v381_v31  ;;  %v476_v53 = vld [vmem:[%s1193_s3 + $0x48] sm:$0xff]  ;;  %v487_v62 = vld [vmem:[%s1193_s3 + $0xa0] sm:$0xff]  ;;  %v486_v0 = vld [vmem:[%s1193_s3 + $0x98] sm:$0xff] }
  0x32   : > { %327 = vmatprep.subr.mxu0 %v282_v55  ;;  %674 = vmatpush3.msra.mxu1 %v365_v32  ;;  %v475_v55 = vld [vmem:[%s1193_s3 + $0x40] sm:$0xff]  ;;  %v485_v2 = vld [vmem:[%s1193_s3 + $0x90] sm:$0xff]  ;;  %v484_v4 = vld [vmem:[%s1193_s3 + $0x88] sm:$0xff] }
  0x33   : > { %328 = vmatpush2.msra.mxu0 %v281_v57  ;;  %675 = vmatprep.subr.mxu1 %v380_v33  ;;  %v474_v57 = vld [vmem:[%s1193_s3 + $0x38] sm:$0xff]  ;;  %v483_v6 = vld [vmem:[%s1193_s3 + $0x80] sm:$0xff] }
  0x34   : > { %329 = vmatprep.subr.mxu0 %v280_v59  ;;  %676 = vmatpush3.msra.mxu1 %v364_v34  ;;  %v473_v59 = vld [vmem:[%s1193_s3 + $0x30] sm:$0xff] }
  0x35   : > { %330 = vmatpush2.msra.mxu0 %v279_v61  ;;  %680 = vmatprep.subr.mxu1 %v498_v35  ;;  %v472_v61 = vld [vmem:[%s1193_s3 + $0x28] sm:$0xff] }
  0x36   : > { %331 = vmatprep.subr.mxu0 %v278_v63  ;;  %v471_v63 = vld [vmem:[%s1193_s3 + $0x20] sm:$0xff] }
  0x37   : > { %332 = vmatpush2.msra.mxu0 %v277_v1  ;;  %v470_v1 = vld [vmem:[%s1193_s3 + $0x18] sm:$0xff] }
  0x38   : > { %333 = vmatprep.subr.mxu0 %v276_v3  ;;  %v469_v3 = vld [vmem:[%s1193_s3 + $0x10] sm:$0xff] }
  0x39   : > { %334 = vmatpush2.msra.mxu0 %v275_v5  ;;  %v468_v5 = vld [vmem:[%s1193_s3 + $0x8] sm:$0xff] }
  0x3a   : > { %335 = vmatprep.subr.mxu0 %v274_v7  ;;  %v467_v7 = vld [vmem:[%s1193_s3] sm:$0xff] }
  0x3b   : > { %336 = vmatpush2.msra.mxu0 %v273_v9 }
  0x3c   : > { %337 = vmatprep.subr.mxu0 %v272_v10 }
  0x3d   : > { %338 = vmatpush2.msra.mxu0 %v271_v11 }
  0x3e   : > { %339 = vmatprep.subr.mxu0 %v270_v12 }
  0x3f   : > { %340 = vmatpush2.msra.mxu0 %v269_v13 }
  0x40   : > { %341 = vmatprep.subr.mxu0 %v268_v14 }
  0x41   : > { %342 = vmatpush2.msra.mxu0 %v267_v15 }
  0x42   : > { %343 = vmatprep.subr.mxu0 %v266_v16  ;;  %v641_v16 = vld [vmem:[%s1194_s4] ss:$0 sm:$0xff] }
  0x43   : > { %344 = vmatpush2.msra.mxu0 %v265_v17 }
  0x44   : > { %345 = vmatprep.subr.mxu0 %v264_v18 }
  0x45   : > { %346 = vmatpush2.msra.mxu0 %v263_v19 }
  0x46   : > { %347 = vmatprep.subr.mxu0 %v262_v20 }
  0x47   : > { %348 = vmatpush2.msra.mxu0 %v261_v21 }
  0x48   : > { %349 = vmatprep.subr.mxu0 %v260_v22 }
  0x49   : > { %350 = vmatpush2.msra.mxu0 %v259_v23 }
  0x4a   : > { %351 = vmatprep.subr.mxu0 %v258_v24 }
  0x4b   : > { %352 = vmatpush2.msra.mxu0 %v257_v26 }
  0x4c   : > { %354 = vmatmul.mubr.f32.vlgmr.msra.gmra.mxu0 %v223_v27 }
 0x10c   : > { %v355_v36 = vpop.f32.mrf.mxu0 }
 0x10d   : > { %v1081_v37 = vsub.f32 %v223_v27, %v355_v36 }
 0x10e   : > { %v357_v38 = vpop.f32.mrf.mxu0 }
 0x10f   : > { %v361_v39 = vsub.f32 %v861_v25, %v357_v38  ;;  %v362_v41 = vmul.f32 %v1081_v37, %v1081_v37  ;;  %v496_v25 = vld [vmem:[%s1193_s3 + $0xe8] sm:$0xff] }
 0x111   : > { %v363_v40 = vmul.f32 %v361_v39, %v361_v39 }
 0x113   : > { %460 = vmatprep.mubr.f32.mxu1 %v363_v40 }
 0x114   : > { %461 = vmatmul.mubr.f32.vlgmr.msra.gmra.mxu1 %v362_v41 }
 0x115   : > { %681 = vmatpush3.msra.mxu1 %v482_v42  ;;  %563 = vmatprep.mubr.f32.mxu1 %v361_v39 }
 0x116   : > { %682 = vmatprep.subr.mxu1 %v497_v43 }
 0x117   : > { %683 = vmatpush3.msra.mxu1 %v481_v44 }
 0x118   : > { %684 = vmatprep.subr.mxu1 %v496_v25 }
 0x119   : > { %685 = vmatpush3.msra.mxu1 %v480_v45 }
 0x11a   : > { %686 = vmatprep.subr.mxu1 %v495_v46 }
 0x11b   : > { %687 = vmatpush3.msra.mxu1 %v479_v47 }
 0x11c   : > { %688 = vmatprep.subr.mxu1 %v494_v48 }
 0x11d   : > { %689 = vmatpush3.msra.mxu1 %v478_v49 }
 0x11e   : > { %690 = vmatprep.subr.mxu1 %v493_v50 }
 0x11f   : > { %691 = vmatpush3.msra.mxu1 %v477_v51 }
 0x120   : > { %692 = vmatprep.subr.mxu1 %v492_v52 }
 0x121   : > { %693 = vmatpush3.msra.mxu1 %v476_v53 }
 0x122   : > { %694 = vmatprep.subr.mxu1 %v491_v54 }
 0x123   : > { %695 = vmatpush3.msra.mxu1 %v475_v55 }
 0x124   : > { %696 = vmatprep.subr.mxu1 %v490_v56 }
 0x125   : > { %697 = vmatpush3.msra.mxu1 %v474_v57 }
 0x126   : > { %698 = vmatprep.subr.mxu1 %v489_v58 }
 0x127   : > { %699 = vmatpush3.msra.mxu1 %v473_v59 }
 0x128   : > { %700 = vmatprep.subr.mxu1 %v488_v60 }
 0x129   : > { %701 = vmatpush3.msra.mxu1 %v472_v61 }
 0x12a   : > { %702 = vmatprep.subr.mxu1 %v487_v62 }
 0x12b   : > { %703 = vmatpush3.msra.mxu1 %v471_v63 }
 0x12c   : > { %704 = vmatprep.subr.mxu1 %v486_v0 }
 0x12d   : > { %705 = vmatpush3.msra.mxu1 %v470_v1 }
 0x12e   : > { %706 = vmatprep.subr.mxu1 %v485_v2 }
 0x12f   : > { %707 = vmatpush3.msra.mxu1 %v469_v3 }
 0x130   : > { %708 = vmatprep.subr.mxu1 %v484_v4 }
 0x131   : > { %709 = vmatpush3.msra.mxu1 %v468_v5 }
 0x132   : > { %710 = vmatprep.subr.mxu1 %v483_v6 }
 0x133   : > { %711 = vmatpush3.msra.mxu1 %v467_v7 }
 0x134   : > { %564 = vmatmul.mubr.f32.vlgmr.msra.gmra.mxu1 %v1081_v37 }
 0x1d4   : > { %v677_v8 = vpop.f32.mrf.mxu1 }
 0x1d6   : > { %v678_v9 = vpop.f32.mrf.mxu1 }
 0x1d7   : > { %v679_v10 = vadd.f32 %v678_v9, %v677_v8 }
 0x1d9   : > { %v463_v11 = vadd.f32 1e-05, %v679_v10 }
 0x1db   : > { %723 = vrsqrt.f32 %v463_v11 }
 0x1e8   : > { %v724_v15 = vpop.eup %723 }
 0x1f4   : > { %v712_v12 = vpop.f32.mrf.mxu1 }
 0x1f6   : > { %v713_v13 = vpop.f32.mrf.mxu1 }
 0x1f7   : > { %v714_v14 = vadd.f32 %v713_v13, %v712_v12 }
 0x1f9   : > { %v569_v17 = vmul.f32 %v724_v15, %v714_v14 }
 0x1fb   : > { %v577_v18 = vadd.f32 %v641_v16, %v569_v17 }
 0x1fd   : > { %725 = vtanh.f32 %v577_v18 }
 0x20a   : > { %v726_v19 = vpop.eup %725 }
 0x20b   : > { %579 = vst [vmem:[%s222_s12] sm:$0xff] %v726_v19 }
 0x20c PF: > { %s15_s18 = sadd.s32 1, %s733_s18  }
 0x20d   : > { %p12_p4 = scmp.ge.s32.totalorder %s15_s18, 4  }
 0x20f   :  { %14 = sbr.rel (!%p12_p4) target bundleno = 1 (0x1), region = 70 }

</bundles_post_ra>
